<compile_context>
chip_gen: v7x
topology: tpu7x:2x2x1
jax: 0.10.0
libtpu: 0.0.40
codegen_flags: <defaults>
</compile_context>

<pallas_src>
import functools

import jax
import jax.numpy as jnp
from jax import lax
from jax.experimental import pallas as pl
from jax.experimental.pallas import tpu as pltpu


def _cdiv(a, b):
    return -(-a // b)


def _round_up(n, m):
    return _cdiv(n, m) * m


# ------------------------------ Pallas kernels ------------------------------

def _kpi_fwd_kernel(matmul_dtype, x_ref, w1_ref, b1_ref, w2_ref, b2_ref, out_ref):
    """relu(W1 @ x + b1) . w2 + b2 for one feature-major batch tile.

    x_ref  : (K, TILE_B)  activations, feature-major / lane-dense (f32 from HBM)
    w1_ref : (H, K)       layer-1 weight (PyTorch (out_features, in_features) layout)
    b1_ref : (H, 1)       layer-1 bias column (f32)
    w2_ref : (H, 1)       layer-2 weight column (num_classes == 1, f32)
    b2_ref : (1,) SMEM    layer-2 bias scalar (f32)
    out_ref: (1, TILE_B)  lane-dense output row (f32)
    """
    # Cast to the MXU dtype *inside* the kernel: HBM sees exactly one f32 read of x.
    x_t = x_ref[...].astype(matmul_dtype)
    # First layer on the MXU: (H, K) x (K, TILE_B) -> (H, TILE_B), f32 accumulation.
    h_t = lax.dot_general(
        w1_ref[...], x_t,
        dimension_numbers=(((1,), (0,)), ((), ())),
        preferred_element_type=jnp.float32)
    # Bias + ReLU on the VPU in f32.  Dropout is identity at inference.
    h_t = jnp.maximum(h_t + b1_ref[...], 0.0)
    # Second layer (num_classes == 1): VPU broadcast-multiply + sublane (XLU) reduction.
    # TODO(synk): on v6e/v7x this could move onto the near-idle MXU as a
    # (1,H)x(H,TILE_B) bf16 matmul, but that adds a bf16 round-trip on relu_h; kept in
    # f32 for precision margin (required on v5e anyway: no bf16 VPU).
    out_row = jnp.sum(h_t * w2_ref[...], axis=0, keepdims=True) + b2_ref[0]
    out_ref[...] = out_row.astype(out_ref.dtype)


def _kpi_fwd_loss_kernel(matmul_dtype, n_valid, tile_b,
                         x_ref, w1_ref, b1_ref, w2_ref, b2_ref, labels_ref,
                         out_ref, loss_part_ref):
    """Forward + per-tile MSE partial sum (lane-dense; batch axis stays parallel)."""
    x_t = x_ref[...].astype(matmul_dtype)
    h_t = lax.dot_general(
        w1_ref[...], x_t,
        dimension_numbers=(((1,), (0,)), ((), ())),
        preferred_element_type=jnp.float32)
    h_t = jnp.maximum(h_t + b1_ref[...], 0.0)
    out_row = jnp.sum(h_t * w2_ref[...], axis=0, keepdims=True) + b2_ref[0]
    out_stored = out_row.astype(out_ref.dtype)
    out_ref[...] = out_stored

    # Mask ragged-tile lanes (>= n_valid): those columns were read past the end of x /
    # labels (garbage) and must not contribute to the loss.
    col = pl.program_id(0) * tile_b + lax.broadcasted_iota(jnp.int32, (1, tile_b), 1)
    diff = jnp.where(col < n_valid,
                     out_stored.astype(jnp.float32) - labels_ref[...],
                     0.0)
    part = jnp.sum(diff * diff, axis=1, keepdims=True)        # (1, 1) per-tile partial
    # Lane-dense store; every lane holds the same value, wrapper divides by 128.
    loss_part_ref[...] = jnp.broadcast_to(part, (1, 128))


# -------------------------------- wrappers --------------------------------

def _jnp_forward(params, x, labels=None, matmul_dtype=jnp.bfloat16):
    """Small-batch fast path (fused XLA; same mixed-precision policy as the kernel)."""
    w1, b1, w2, b2 = params
    h = jnp.maximum(
        jnp.dot(x.astype(matmul_dtype), w1.astype(matmul_dtype).T,
                preferred_element_type=jnp.float32) + b1[:, 0], 0.0)
    out = jnp.dot(h, w2, precision=lax.Precision.HIGHEST,
                  preferred_element_type=jnp.float32) + b2
    if labels is None:
        return out
    loss = jnp.mean((out[:, 0] - labels.astype(jnp.float32)) ** 2)
    return loss, out


def kpi_forward(params, x, labels=None, *, tile_b=16384, matmul_dtype=jnp.bfloat16,
                min_pallas_batch=2048, x_transposed=False):
    """Mirrors KPIModel.forward (hidden_layers == 1, eval-mode dropout, num_classes == 1).

    x is (B, K) as in the PyTorch module; pass x_transposed=True with x of shape (K, B)
    if the upstream producer can emit it feature-major (saves one transpose pass).
    """
    w1, b1, w2, b2 = params           # (H,K), (H,1), (H,C), (C,)
    H, K = w1.shape
    C = w2.shape[1]
    if C != 1:
        # TODO(synk): generic num_classes > 1 path (PyTorch's squeeze(1)+MSE only makes
        # sense for C == 1 anyway); would need a (TILE_B, C) second-layer matmul.
        raise NotImplementedError("kpi_forward kernel supports num_classes == 1 only")

    if x_transposed:
        assert x.shape[0] == K
        B = x.shape[1]
        xm = x                                   # already (K, B) feature-major
    else:
        B = x.shape[0]
        assert x.shape[1] == K
        if B < min_pallas_batch:
            # At tiny batches (the deployed B=8) a 1-step Pallas grid is pure launch /
            # step overhead; a fused XLA GEMM+elementwise wins on every generation.
            return _jnp_forward(params, x, labels, matmul_dtype)
        # One extra pass over x; ideally the producer emits x feature-major already.
        xm = x.T                                 # (K, B), lane-dense batch axis

    # Tile size: large enough to amortize the ~0.35 us grid-step overhead, capped so
    # num_tiles >= 2 where possible (v7x has 2 TensorCores sharding the parallel axis).
    tb = max(128, min(int(tile_b), _round_up(_cdiv(B, 2), 128)))
    num_tiles = _cdiv(B, tb)
    b_pad = num_tiles * tb

    w1m = w1.astype(matmul_dtype)                # tiny (H, K); negligible wrapper cast

    x_spec = pl.BlockSpec((K, tb), lambda i: (0, i))      # streamed, lane-dense
    w1_spec = pl.BlockSpec((H, K), lambda i: (0, 0))      # resident across grid steps
    b1_spec = pl.BlockSpec((H, 1), lambda i: (0, 0))
    w2_spec = pl.BlockSpec((H, 1), lambda i: (0, 0))
    b2_spec = pl.BlockSpec(memory_space=pltpu.SMEM)       # scalar bias in SMEM
    out_spec = pl.BlockSpec((1, tb), lambda i: (0, i))    # lane-dense output row

    # Feature-major x blocks: f32 (32, 16384) = 2 MiB x2 buffers + (64, 16384) f32
    # intermediates ~ well under 32 MiB on all generations; raise the scoped budget
    # explicitly because v5e's default is only 16 MiB.
    cparams = pltpu.CompilerParams(
        dimension_semantics=("parallel",),
        vmem_limit_bytes=32 * 1024 * 1024)

    if labels is None:
        out_row = pl.pallas_call(
            functools.partial(_kpi_fwd_kernel, matmul_dtype),
            grid=(num_tiles,),
            in_specs=[x_spec, w1_spec, b1_spec, w2_spec, b2_spec],
            out_specs=out_spec,
            out_shape=jax.ShapeDtypeStruct((1, b_pad), jnp.float32),
            compiler_params=cparams,
        )(xm, w1m, b1, w2, b2)
        return out_row[0, :B].reshape(B, C)

    labels_row = labels.reshape(1, B).astype(jnp.float32)     # lane-dense, no padding
    labels_spec = pl.BlockSpec((1, tb), lambda i: (0, i))
    lpart_spec = pl.BlockSpec((1, 128), lambda i: (0, i))

    kernel = functools.partial(_kpi_fwd_loss_kernel, matmul_dtype, B, tb)
    out_row, lparts = pl.pallas_call(
        kernel,
        grid=(num_tiles,),
        in_specs=[x_spec, w1_spec, b1_spec, w2_spec, b2_spec, labels_spec],
        out_specs=(out_spec, lpart_spec),
        out_shape=(jax.ShapeDtypeStruct((1, b_pad), jnp.float32),
                   jax.ShapeDtypeStruct((1, num_tiles * 128), jnp.float32)),
        compiler_params=cparams,
    )(xm, w1m, b1, w2, b2, labels_row)

    # All 128 lanes of each per-tile partial are identical -> plain dense sum, no
    # strided ::128 gather.
    loss = jnp.sum(lparts) / (128.0 * B)
    outputs = out_row[0, :B].reshape(B, C)
    return loss, outputs


# ----------------------------- params / reference -----------------------------

def init_kpi_params(key, input_size, hidden_size, num_classes=1):
    """PyTorch-style Linear init U(-1/sqrt(fan_in), 1/sqrt(fan_in)), kernel layout."""
    k1, k2, k3, k4 = jax.random.split(key, 4)
    lim1 = 1.0 / (input_size ** 0.5)
    lim2 = 1.0 / (hidden_size ** 0.5)
    w1 = jax.random.uniform(k1, (hidden_size, input_size), jnp.float32, -lim1, lim1)
    b1 = jax.random.uniform(k2, (hidden_size, 1), jnp.float32, -lim1, lim1)
    w2 = jax.random.uniform(k3, (hidden_size, num_classes), jnp.float32, -lim2, lim2)
    b2 = jax.random.uniform(k4, (num_classes,), jnp.float32, -lim2, lim2)
    return (w1, b1, w2, b2)


def _reference_forward(params, x, labels=None, matmul_dtype=jnp.bfloat16):
    """Pure-JAX reference with the same mixed-precision policy as the kernel."""
    w1, b1, w2, b2 = params
    xm = x.astype(matmul_dtype).astype(jnp.float32)
    w1m = w1.astype(matmul_dtype).astype(jnp.float32)
    h = jnp.maximum(
        jnp.matmul(xm, w1m.T, precision=lax.Precision.HIGHEST) + b1[:, 0], 0.0)
    out = jnp.matmul(h, w2, precision=lax.Precision.HIGHEST) + b2
    if labels is None:
        return out
    loss = jnp.mean((out[:, 0] - labels) ** 2)
    return loss, out


# ----------------------------------- main -----------------------------------

if __name__ == "__main__":
    # args.kpi_input_size=32, kpi_hidden_size=64, kpi_num_classes=1, kpi_hidden_layers=1.
    batch, input_size, hidden_size, num_classes = 8, 32, 64, 1

    key = jax.random.PRNGKey(0)
    k_params, k_x, k_lbl, k_x2, k_lbl2 = jax.random.split(key, 5)

    params = init_kpi_params(k_params, input_size, hidden_size, num_classes)
    x = jax.random.normal(k_x, (batch, input_size), dtype=jnp.float32)
    labels = jax.random.normal(k_lbl, (batch,), dtype=jnp.float32)

    ref_out = _reference_forward(params, x)
    ref_loss, _ = _reference_forward(params, x, labels)

    # (a) Deployed toy shape, forcing the Pallas path (min_pallas_batch=0) so the
    #     kernel itself is exercised.
    outputs = jax.block_until_ready(kpi_forward(params, x, min_pallas_batch=0))
    assert outputs.shape == (batch, num_classes)
    loss, outputs2 = kpi_forward(params, x, labels, min_pallas_batch=0)
    loss = jax.block_until_ready(loss)
    outputs2 = jax.block_until_ready(outputs2)
    assert outputs2.shape == (batch, num_classes)
    assert loss.shape == ()
    assert jnp.allclose(outputs, ref_out, atol=1e-4, rtol=1e-4), "output mismatch"
    assert jnp.allclose(outputs2, ref_out, atol=1e-4, rtol=1e-4), "output mismatch (loss path)"
    assert jnp.allclose(loss, ref_loss, atol=1e-4, rtol=1e-4), "loss mismatch"

    # (b) Default small-batch fast path (no Pallas launch) must agree too.
    fp_out = jax.block_until_ready(kpi_forward(params, x))
    fp_loss, _ = kpi_forward(params, x, labels)
    assert jnp.allclose(fp_out, ref_out, atol=1e-4, rtol=1e-4), "fast-path output mismatch"
    assert jnp.allclose(fp_loss, ref_loss, atol=1e-4, rtol=1e-4), "fast-path loss mismatch"

    # (c) Multi-tile ragged batch: exercises the >=2-tile split and the in-kernel
    #     masking of out-of-bounds lanes on the last tile.
    big_batch = 300
    x_big = jax.random.normal(k_x2, (big_batch, input_size), dtype=jnp.float32)
    labels_big = jax.random.normal(k_lbl2, (big_batch,), dtype=jnp.float32)
    loss_big, out_big = kpi_forward(params, x_big, labels_big, min_pallas_batch=0)
    loss_big = jax.block_until_ready(loss_big)
    out_big = jax.block_until_ready(out_big)
    ref_loss_big, ref_out_big = _reference_forward(params, x_big, labels_big)
    assert out_big.shape == (big_batch, num_classes)
    assert jnp.allclose(out_big, ref_out_big, atol=1e-4, rtol=1e-4), "big-batch output mismatch"
    assert jnp.allclose(loss_big, ref_loss_big, atol=1e-4, rtol=1e-4), "big-batch loss mismatch"

    print("KERNEL_OK")
</pallas_src>

<mosaic_0001>
module attributes {stable_mosaic.version = 11 : i64} {
  func.func @_kpi_fwd_kernel(%arg0: i32, %arg1: memref<32x128xf32, #tpu.memory_space<vmem>>, %arg2: memref<64x32xbf16, #tpu.memory_space<vmem>>, %arg3: memref<64x1xf32, #tpu.memory_space<vmem>>, %arg4: memref<64x1xf32, #tpu.memory_space<vmem>>, %arg5: memref<1xf32, #tpu.memory_space<smem>>, %arg6: memref<1x128xf32, #tpu.memory_space<vmem>>) attributes {dimension_semantics = [#tpu.dimension_semantics<parallel>], iteration_bounds = array<i64: 1>, scalar_prefetch = 0 : i64, scratch_operands = 0 : i64, tpu.core_type = #tpu.core_type<tc>, window_params = [{transform_indices = @transform_0, window_bounds = array<i64: 32, 128>}, {pipeline_mode = #tpu.pipeline_mode<synchronous>, transform_indices = @transform_1, window_bounds = array<i64: 64, 32>}, {pipeline_mode = #tpu.pipeline_mode<synchronous>, transform_indices = @transform_2, window_bounds = array<i64: 64, 1>}, {pipeline_mode = #tpu.pipeline_mode<synchronous>, transform_indices = @transform_3, window_bounds = array<i64: 64, 1>}, {transform_indices = @transform_4, window_bounds = array<i64: 1>}, {transform_indices = @transform_5, window_bounds = array<i64: 1, 128>}]} {
    %c0 = arith.constant 0 : index
    %c0_0 = arith.constant 0 : index
    %0 = vector.load %arg1[%c0, %c0_0] : memref<32x128xf32, #tpu.memory_space<vmem>>, vector<32x128xf32>
    %1 = arith.truncf %0 : vector<32x128xf32> to vector<32x128xbf16>
    %c0_1 = arith.constant 0 : index
    %c0_2 = arith.constant 0 : index
    %2 = vector.load %arg2[%c0_1, %c0_2] : memref<64x32xbf16, #tpu.memory_space<vmem>>, vector<64x32xbf16>
    %cst = arith.constant dense<0.000000e+00> : vector<64x128xf32>
    %3 = tpu.matmul %2, %1, %cst {dimension_numbers = #tpu.dot_dimension_numbers<[1], [0], [0], [1], [0, 0, 1, 1], [], []>} : vector<64x32xbf16>, vector<32x128xbf16>, vector<64x128xf32> -> vector<64x128xf32>
    %c0_3 = arith.constant 0 : index
    %c0_4 = arith.constant 0 : index
    %4 = vector.load %arg3[%c0_3, %c0_4] : memref<64x1xf32, #tpu.memory_space<vmem>>, vector<64x1xf32>
    %5 = vector.broadcast %4 : vector<64x1xf32> to vector<64x128xf32>
    %6 = arith.addf %3, %5 : vector<64x128xf32>
    %cst_5 = arith.constant 0.000000e+00 : f32
    %7 = vector.broadcast %cst_5 : f32 to vector<64x128xf32>
    %8 = arith.maximumf %6, %7 : vector<64x128xf32>
    %c0_6 = arith.constant 0 : index
    %c0_7 = arith.constant 0 : index
    %9 = vector.load %arg4[%c0_6, %c0_7] : memref<64x1xf32, #tpu.memory_space<vmem>>, vector<64x1xf32>
    %10 = vector.broadcast %9 : vector<64x1xf32> to vector<64x128xf32>
    %11 = arith.mulf %8, %10 : vector<64x128xf32>
    %cst_8 = arith.constant dense<0.000000e+00> : vector<128xf32>
    %12 = vector.multi_reduction <add>, %11, %cst_8 [0] : vector<64x128xf32> to vector<128xf32>
    %13 = vector.shape_cast %12 : vector<128xf32> to vector<1x128xf32>
    %c0_9 = arith.constant 0 : index
    %14 = memref.load %arg5[%c0_9] : memref<1xf32, #tpu.memory_space<smem>>
    %15 = vector.broadcast %14 : f32 to vector<1x128xf32>
    %16 = arith.addf %13, %15 : vector<1x128xf32>
    %c0_10 = arith.constant 0 : index
    %c0_11 = arith.constant 0 : index
    %17 = vector.load %arg6[%c0_10, %c0_11] : memref<1x128xf32, #tpu.memory_space<vmem>>, vector<1x128xf32>
    tpu.vector_store %arg6[%c0_10, %c0_11], %16 {strides = array<i32>} : memref<1x128xf32, #tpu.memory_space<vmem>>, vector<1x128xf32>,
    return
  }
  func.func @transform_0(%arg0: i32) -> (i32, i32) {
    %c0_i32 = arith.constant 0 : i32
    %c0_i32_0 = arith.constant 0 : i32
    return %c0_i32, %arg0 : i32, i32
  }
  func.func @transform_1(%arg0: i32) -> (i32, i32) {
    %c0_i32 = arith.constant 0 : i32
    %c0_i32_0 = arith.constant 0 : i32
    %c0_i32_1 = arith.constant 0 : i32
    return %c0_i32, %c0_i32_0 : i32, i32
  }
  func.func @transform_2(%arg0: i32) -> (i32, i32) {
    %c0_i32 = arith.constant 0 : i32
    %c0_i32_0 = arith.constant 0 : i32
    %c0_i32_1 = arith.constant 0 : i32
    return %c0_i32, %c0_i32_0 : i32, i32
  }
  func.func @transform_3(%arg0: i32) -> (i32, i32) {
    %c0_i32 = arith.constant 0 : i32
    %c0_i32_0 = arith.constant 0 : i32
    %c0_i32_1 = arith.constant 0 : i32
    return %c0_i32, %c0_i32_0 : i32, i32
  }
  func.func @transform_4(%arg0: i32) -> i32 {
    %c0_i32 = arith.constant 0 : i32
    %c0_i32_0 = arith.constant 0 : i32
    return %c0_i32 : i32
  }
  func.func @transform_5(%arg0: i32) -> (i32, i32) {
    %c0_i32 = arith.constant 0 : i32
    %c0_i32_0 = arith.constant 0 : i32
    return %c0_i32, %arg0 : i32, i32
  }
}

</mosaic_0001>

<bundles_post_ra>
// kernel: tpu_custom_call.1
= control target key start
LH: loop header
LB: loop body
LE: loop exit
PB: predicated region body
PF: predicated region fallthrough
CT: control target
= control target key end

     0   :  { %v340_v5 = vmov 0   ;;  %vm105_vm0 = vcmask 261120   ;;  %s463_s0 = inlined_call_operand.vmem [shape: f32[32,8], index: 0, kind: input, shape index: {}]   ;;  %s464_s1 = inlined_call_operand.vmem [shape: bf16[64,32], index: 1, kind: input, shape index: {}]   ;;  %s465_s2 = inlined_call_operand.vmem [shape: f32[64,1], index: 2, kind: input, shape index: {}]   ;;  %s466_s3 = inlined_call_operand.vmem [shape: f32[64,1], index: 3, kind: input, shape index: {}]   ;;  %s467_s4 = inlined_call_operand.<no memory space> [shape: f32[1], index: 4, kind: input, shape index: {}]   ;;  %s468_s5 = inlined_call_operand.hbm [shape: f32[1,128], index: 5, kind: output, shape index: {}]  }
   0x1   :  { %v23_v0 = vld [vmem:[%s463_s0] sm:$0xff]  ;;  %v24_v1 = vld [vmem:[%s463_s0 + $0x8] sm:$0xff]  ;;  %v25_v2 = vld [vmem:[%s463_s0 + $0x10] sm:$0xff]  ;;  %310 = vset.pattern.permute.xlu0 %v340_v5  ;;  %311 = vset.pattern.permute.xlu1 %v340_v5 }
   0x2   :  { %v27_v3 = vpack.c.bf16 %v24_v1, %v23_v0  ;;  %v26_v4 = vld [vmem:[%s463_s0 + $0x18] sm:$0xff]  ;;  %v312_v7 = vld [vmem:[%s464_s1] sm:$0xff]   ;;  %v313_v8 = vld [vmem:[%s464_s1 + $0x10] sm:$0xff]  }
   0x3   :  { %v28_v6 = vpack.c.bf16 %v26_v4, %v25_v2  ;;  %v37_v9 = vld [vmem:[%s465_s2] sm:$0xff]  ;;  %v39_v10 = vld [vmem:[%s465_s2 + $0x10] sm:$0xff]  ;;  %296 = vmatprep.mubr.msk.bf16.mxu0 %vm105_vm0, %v312_v7  ;;  %300 = vmatprep.mubr.msk.bf16.mxu1 %vm105_vm0, %v313_v8  ;;  %v314_v11 = vld [vmem:[%s464_s1 + $0x8] sm:$0xff]  }
   0x4   :  { %292 = vmatprep.subr.bf16.mxu0 %v27_v3  ;;  %304 = vmatprep.subr.bf16.mxu1 %v27_v3  ;;  %v315_v12 = vld [vmem:[%s464_s1 + $0x18] sm:$0xff]   ;;  %v38_v13 = vld [vmem:[%s465_s2 + $0x8] sm:$0xff] }
   0x5   :  { %293 = vmatpush3.bf16.msra.mxu0 %v27_v3  ;;  %306 = vmatpush3.bf16.msra.mxu1 %v27_v3  ;;  %v40_v14 = vld [vmem:[%s465_s2 + $0x18] sm:$0xff] }
   0x6   :  { %294 = vmatprep.subr.bf16.mxu0 %v28_v6  ;;  %305 = vmatprep.subr.bf16.mxu1 %v28_v6 }
   0x7   :  { %47 = vperm.xlu0 %310, %v37_v9   ;;  %57 = vperm.xlu1 %311, %v39_v10  }
   0x9   :  { %295 = vmatpush3.bf16.msra.mxu0 %v28_v6  ;;  %307 = vmatpush3.bf16.msra.mxu1 %v28_v6 }
   0xa   :  { %11 = vsyncpa [#allocation4], 0  ;;  %v191_v15 = vld [vmem:[%s466_s3] sm:$0xff]  ;;  %v192_v16 = vld [vmem:[%s466_s3 + $0x8] sm:$0xff]  ;;  %s341_s13 = smov [#allocation3]  }
   0xb   :  { %52 = vperm.xlu0 %310, %v38_v13   ;;  %62 = vperm.xlu1 %311, %v40_v14   ;;  %v41_v17 = vld [vmem:[%s465_s2 + $0x20] sm:$0xff]  ;;  %v193_v18 = vld [vmem:[%s466_s3 + $0x10] sm:$0xff]  ;;  %v42_v19 = vld [vmem:[%s465_s2 + $0x28] sm:$0xff]  ;;  %s270_s14 = sshll.u32 %s341_s13, 4  ;;  %s271_s14 = int_to_ptr.vmem [resolvable:$true] %s270_s14 }
   0xc   :  { %297 = vmatmul.mubr.msk.bf16.vlgmr.msra.gmra.mrb[0].mxu0 %vm105_vm0, %v314_v11  ;;  %301 = vmatmul.mubr.msk.bf16.vlgmr.msra.gmra.mrb[0].mxu1 %vm105_vm0, %v315_v12  ;;  %v194_v20 = vld [vmem:[%s466_s3 + $0x18] sm:$0xff]  ;;  %v43_v21 = vld [vmem:[%s465_s2 + $0x30] sm:$0xff]  ;;  %v195_v22 = vld [vmem:[%s466_s3 + $0x20] sm:$0xff]  ;;  %s316_s15 = scalar_lea.vmem %s271_s14, 16  ;;  %s320_s1 = scalar_lea.vmem %s271_s14, 32 }
   0xd   :  { %v44_v23 = vld [vmem:[%s465_s2 + $0x38] sm:$0xff]  ;;  %v196_v24 = vld [vmem:[%s466_s3 + $0x28] sm:$0xff]  ;;  %v197_v25 = vld [vmem:[%s466_s3 + $0x30] sm:$0xff]  ;;  %p317_p0 = scmp.ne.s32.totalorder %s271_s14, %s316_s15  ;;  %p321_p1 = scmp.lt.s32.totalorder %s271_s14, %s271_s14 }
   0xe   :  { %v198_v26 = vld [vmem:[%s466_s3 + $0x38] sm:$0xff]  ;;  %p322_p2 = scmp.lt.s32.totalorder %s320_s1, %s316_s15 }
   0xf   :  { %201 = vperm.xlu0 %310, %v191_v15   ;;  %206 = vperm.xlu1 %311, %v192_v16  }
  0x10   :  { %p323_p3 = por %p322_p2, %p321_p1 }
  0x12   :  { %p324_p4 = pnand %p323_p3, %p317_p0 }
  0x13   :  { %67 = vperm.xlu0 %310, %v41_v17   ;;  %211 = vperm.xlu1 %311, %v193_v18  }
  0x17   :  { %72 = vperm.xlu0 %310, %v42_v19   ;;  %216 = vperm.xlu1 %311, %v194_v20  }
  0x1b   :  { %77 = vperm.xlu0 %310, %v43_v21   ;;  %221 = vperm.xlu1 %311, %v195_v22  }
  0x1f   :  { %82 = vperm.xlu0 %310, %v44_v23   ;;  %226 = vperm.xlu1 %311, %v196_v24   ;;  %v261_v23 = vstv %s467_s4 }
  0x23   :  { %231 = vperm.xlu0 %310, %v197_v25   ;;  %236 = vperm.xlu1 %311, %v198_v26  }
  0x86   :  { %v48_v27 = vpop.permute.xlu0 %47  ;;  %v58_v28 = vpop.permute.xlu1 %57 }
  0x8a   :  { %v53_v29 = vpop.permute.xlu0 %52  ;;  %v63_v30 = vpop.permute.xlu1 %62 }
  0x8e   :  { %v202_v31 = vpop.permute.xlu0 %201  ;;  %v207_v32 = vpop.permute.xlu1 %206 }
  0x92   :  { %v68_v33 = vpop.permute.xlu0 %67  ;;  %v212_v34 = vpop.permute.xlu1 %211 }
  0x96   :  { %v73_v35 = vpop.permute.xlu0 %72  ;;  %v217_v36 = vpop.permute.xlu1 %216 }
  0x9a   :  { %v78_v50 = vpop.permute.xlu0 %77  ;;  %v222_v54 = vpop.permute.xlu1 %221 }
  0x9e   :  { %v83_v63 = vpop.permute.xlu0 %82  ;;  %v227_v4 = vpop.permute.xlu1 %226 }
  0xa2   :  { %v232_v11 = vpop.permute.xlu0 %231  ;;  %v237_v14 = vpop.permute.xlu1 %236 }
  0xdf   :  { %v298_v37 = vpop.f32.mrb[0].mxu0  ;;  %v302_v38 = vpop.f32.mrb[0].mxu1 }
  0xe0   :  { %v152_v39 = vpop.f32.mrb[1].mxu0  ;;  %v168_v40 = vpop.f32.mrb[1].mxu1  ;;  %v161_v41 = vadd.f32 %v298_v37, %v58_v28  ;;  %v177_v60 = vadd.f32 %v302_v38, %v78_v50 }
  0xe1   :  { %v153_v42 = vadd.f32 %v152_v39, %v48_v27  ;;  %v299_v43 = vpop.f32.mrb[2].mxu0  ;;  %v303_v44 = vpop.f32.mrb[2].mxu1  ;;  %v169_v52 = vadd.f32 %v168_v40, %v68_v33 }
  0xe2   :  { %v155_v45 = vpop.f32.mrb[3].mxu0  ;;  %v171_v46 = vpop.f32.mrb[3].mxu1  ;;  %v164_v48 = vadd.f32 %v299_v43, %v63_v30  ;;  %v185_v51 = vmax.f32 %v161_v41, 0.0  ;;  %v180_v1 = vadd.f32 %v303_v44, %v83_v63  ;;  %v189_v5 = vmax.f32 %v177_v60, 0.0 }
  0xe3   :  { %v183_v47 = vmax.f32 %v153_v42, 0.0  ;;  %v156_v49 = vadd.f32 %v155_v45, %v53_v29  ;;  %v172_v58 = vadd.f32 %v171_v46, %v73_v35  ;;  %v187_v61 = vmax.f32 %v169_v52, 0.0 }
  0xe4   :  { %v186_v56 = vmax.f32 %v164_v48, 0.0  ;;  %v241_v59 = vmul.f32 %v212_v34, %v185_v51  ;;  %v190_v8 = vmax.f32 %v180_v1, 0.0  ;;  %v245_v12 = vmul.f32 %v232_v11, %v189_v5 }
  0xe5   :  { %v184_v53 = vmax.f32 %v156_v49, 0.0  ;;  %v239_v55 = vmul.f32 %v202_v31, %v183_v47  ;;  %v188_v3 = vmax.f32 %v172_v58, 0.0  ;;  %v243_v6 = vmul.f32 %v222_v54, %v187_v61 }
  0xe6   :  { %v242_v0 = vmul.f32 %v217_v36, %v186_v56  ;;  %v246_v15 = vmul.f32 %v237_v14, %v190_v8 }
  0xe7   :  { %v240_v57 = vmul.f32 %v207_v32, %v184_v53  ;;  %v244_v9 = vmul.f32 %v227_v4, %v188_v3 }
  0xe9   :  { %v247_v62 = vadd.f32 %v240_v57, %v239_v55 }
  0xeb   :  { %v248_v2 = vadd.f32 %v247_v62, %v241_v59 }
  0xed   :  { %v249_v7 = vadd.f32 %v248_v2, %v242_v0 }
  0xef   :  { %v250_v10 = vadd.f32 %v249_v7, %v243_v6 }
  0xf1   :  { %v251_v13 = vadd.f32 %v250_v10, %v244_v9 }
  0xf3   :  { %v252_v16 = vadd.f32 %v251_v13, %v245_v12 }
  0xf5   :  { %v253_v17 = vadd.f32 %v252_v16, %v246_v15 }
  0xf7   :  { %v254_v18 = vrot.slane %v253_v17, 4 }
  0xf9   :  { %v255_v19 = vadd.f32 %v254_v18, %v253_v17 }
  0xfb   :  { %v256_v20 = vrot.slane %v255_v19, 2 }
  0xfd   :  { %v257_v21 = vadd.f32 %v256_v20, %v255_v19 }
  0xff   :  { %v258_v22 = vrot.slane %v257_v21, 1 }
 0x101   :  { %v259_v24 = vadd.f32 %v258_v22, %v257_v21 }
 0x103   :  { %v262_v25 = vadd.f32 %v261_v23, %v259_v24 }
 0x105   :  { %263 = vst [vmem:[#allocation3] sm:$0x1] %v262_v25 }
 0x106   :  { %327 = shalt.err (!%p324_p4)
}
 0x107   :  { %s328_s18 = scalar_lea.hbm %s468_s5, 16 }
 0x108   :  { %p329_p5 = scmp.ne.s32.totalorder %s468_s5, %s328_s18  ;;  %p332_p6 = scmp.lt.u32.totalorder %s328_s18, %s468_s5 }
 0x10a   :  { %p334_p7 = pnand %p332_p6, %p329_p5 }
 0x10c   :  { %337 = shalt.err (!%p334_p7)
}
 0x10d   :  { %273 = dma.vmem_to_hbm [thread:$0]  %s271_s14, 16, %s468_s5, [#allocation4]  }
 0x10e   :  { %338 = dma.done.wait [#allocation4], 16  }
 0x10f   :  { %339 = vsyncadd [#allocation4], 4294967280 }
 0x110   :  { %277 = vsyncpa [#allocation4], 1 }

</bundles_post_ra>
